<compile_context>
chip_gen: v6e
topology: v6e:2x2x1
jax: 0.10.0
libtpu: 0.0.40
codegen_flags: <defaults>
</compile_context>

<pallas_src>
import functools
import math

import jax
import jax.numpy as jnp
from jax.experimental import pallas as pl
from jax.experimental.pallas import tpu as pltpu


LN_EPS = 1e-12
VMEM_LIMIT = 64 * 1024 * 1024  # fits v7x's 64 MiB physical VMEM


def _pick_tile(m, candidates=(512, 256, 128, 64, 32, 16, 8)):
    """Largest row tile (multiple of 8) that divides m; falls back to m."""
    for t in candidates:
        if t <= m and m % t == 0:
            return t
    return m


# ---------------------------- Pallas kernels ----------------------------

def _layernorm_kernel(x_ref, g_ref, b_ref, o_ref, *, eps):
    x = x_ref[...].astype(jnp.float32)
    mean = jnp.mean(x, axis=-1, keepdims=True)
    var = jnp.mean(jnp.square(x - mean), axis=-1, keepdims=True)
    y = (x - mean) * jax.lax.rsqrt(var + eps)
    o_ref[...] = (y * g_ref[...] + b_ref[...]).astype(o_ref.dtype)


def layernorm(x, gamma, beta, out_dtype=jnp.bfloat16, eps=LN_EPS):
    """Row-wise LayerNorm (used for the embedding sum), tiled over rows."""
    M, H = x.shape
    tm = _pick_tile(M)
    return pl.pallas_call(
        functools.partial(_layernorm_kernel, eps=eps),
        out_shape=jax.ShapeDtypeStruct((M, H), out_dtype),
        grid=(M // tm,),
        in_specs=[pl.BlockSpec((tm, H), lambda i: (i, 0)),
                  pl.BlockSpec((1, H), lambda i: (0, 0)),
                  pl.BlockSpec((1, H), lambda i: (0, 0))],
        out_specs=pl.BlockSpec((tm, H), lambda i: (i, 0)),
        compiler_params=pltpu.CompilerParams(
            dimension_semantics=("parallel",),
            vmem_limit_bytes=VMEM_LIMIT),
    )(x, gamma.reshape(1, H), beta.reshape(1, H))


def _encoder_layer_kernel(x_ref, bias_ref,
                          wqkv_ref, bqkv_ref, wo_ref, bo_ref, g1_ref, b1_ref,
                          wi_ref, bi_ref, wo2_ref, bo2_ref, g2_ref, b2_ref,
                          o_ref, *, num_heads, eps):
    """Per-batch fully-fused BERT layer:

    QKV proj -> multi-head attention -> out proj -> +res -> LN1
    -> wi matmul -> erf-GELU -> wo2 matmul -> +res -> LN2.
    Heads are split/merged entirely in VMEM; no [B*nH, S, Dh] tensors in HBM,
    and the attention output never leaves VMEM before the FFN consumes it.
    """
    x = x_ref[0]                                       # (S, H) bf16
    S, H = x.shape
    Dh = H // num_heads
    scale = 1.0 / math.sqrt(Dh)

    # ---- attention half ----
    qkv = jnp.dot(x, wqkv_ref[...], preferred_element_type=jnp.float32)
    qkv = qkv + bqkv_ref[...]                          # (S, 3H) f32
    bias = bias_ref[0]                                 # (1, S) f32 additive mask

    ctx_heads = []
    for h in range(num_heads):                         # static unroll over heads
        qh = qkv[:, h * Dh:(h + 1) * Dh].astype(jnp.bfloat16)
        kh = qkv[:, H + h * Dh:H + (h + 1) * Dh].astype(jnp.bfloat16)
        vh = qkv[:, 2 * H + h * Dh:2 * H + (h + 1) * Dh].astype(jnp.bfloat16)
        s = jnp.einsum('qd,kd->qk', qh, kh,
                       preferred_element_type=jnp.float32) * scale + bias
        s = s - jnp.max(s, axis=-1, keepdims=True)     # softmax in f32
        p = jnp.exp(s)
        p = p * pl.reciprocal(jnp.sum(p, axis=-1, keepdims=True), approx=True)
        ctx_heads.append(jnp.dot(p.astype(jnp.bfloat16), vh,
                                 preferred_element_type=jnp.float32))
    ctx = jnp.concatenate(ctx_heads, axis=-1).astype(jnp.bfloat16)   # (S, H)

    attn_out = jnp.dot(ctx, wo_ref[...],
                       preferred_element_type=jnp.float32) + bo_ref[...]
    y = attn_out + x.astype(jnp.float32)               # residual in f32
    mean = jnp.mean(y, axis=-1, keepdims=True)
    var = jnp.mean(jnp.square(y - mean), axis=-1, keepdims=True)
    y = (y - mean) * jax.lax.rsqrt(var + eps)
    y = y * g1_ref[...] + b1_ref[...]                  # LN1 output, f32 (S, H)

    # ---- FFN half (residual stays in f32, never touches HBM) ----
    h1 = jnp.dot(y.astype(jnp.bfloat16), wi_ref[...],
                 preferred_element_type=jnp.float32) + bi_ref[...]
    h1 = jax.nn.gelu(h1, approximate=False)            # exact erf GELU, f32
    z = jnp.dot(h1.astype(jnp.bfloat16), wo2_ref[...],
                preferred_element_type=jnp.float32) + bo2_ref[...]
    z = z + y                                          # residual in f32
    mean = jnp.mean(z, axis=-1, keepdims=True)
    var = jnp.mean(jnp.square(z - mean), axis=-1, keepdims=True)
    z = (z - mean) * jax.lax.rsqrt(var + eps)
    o_ref[0] = (z * g2_ref[...] + b2_ref[...]).astype(o_ref.dtype)


def encoder_layer(x_bsh, mask_bias, layer, num_heads):
    B, S, H = x_bsh.shape
    I = layer["wi"].shape[1]
    return pl.pallas_call(
        functools.partial(_encoder_layer_kernel, num_heads=num_heads,
                          eps=LN_EPS),
        out_shape=jax.ShapeDtypeStruct((B, S, H), jnp.bfloat16),
        grid=(B,),
        in_specs=[pl.BlockSpec((1, S, H), lambda b: (b, 0, 0)),
                  pl.BlockSpec((1, 1, S), lambda b: (b, 0, 0)),
                  pl.BlockSpec((H, 3 * H), lambda b: (0, 0)),
                  pl.BlockSpec((1, 3 * H), lambda b: (0, 0)),
                  pl.BlockSpec((H, H), lambda b: (0, 0)),
                  pl.BlockSpec((1, H), lambda b: (0, 0)),
                  pl.BlockSpec((1, H), lambda b: (0, 0)),
                  pl.BlockSpec((1, H), lambda b: (0, 0)),
                  pl.BlockSpec((H, I), lambda b: (0, 0)),
                  pl.BlockSpec((1, I), lambda b: (0, 0)),
                  pl.BlockSpec((I, H), lambda b: (0, 0)),
                  pl.BlockSpec((1, H), lambda b: (0, 0)),
                  pl.BlockSpec((1, H), lambda b: (0, 0)),
                  pl.BlockSpec((1, H), lambda b: (0, 0))],
        out_specs=pl.BlockSpec((1, S, H), lambda b: (b, 0, 0)),
        compiler_params=pltpu.CompilerParams(
            dimension_semantics=("parallel",),
            vmem_limit_bytes=VMEM_LIMIT),
    )(x_bsh, mask_bias,
      layer["wqkv"], layer["bqkv"].reshape(1, 3 * H),
      layer["wo"], layer["bo"].reshape(1, H),
      layer["ln1_g"].reshape(1, H), layer["ln1_b"].reshape(1, H),
      layer["wi"], layer["bi"].reshape(1, I),
      layer["wo2"], layer["bo2"].reshape(1, H),
      layer["ln2_g"].reshape(1, H), layer["ln2_b"].reshape(1, H))


def _head_kernel(cls_ref, pw_ref, pb_ref, aw_ref, ab_ref, o_ref):
    """Fused BertPooler tanh + additional_linear on the CLS rows."""
    cls = cls_ref[...]
    pooled = jnp.tanh(jnp.dot(cls, pw_ref[...],
                              preferred_element_type=jnp.float32) + pb_ref[...])
    out = jnp.dot(pooled.astype(jnp.bfloat16), aw_ref[...],
                  preferred_element_type=jnp.float32) + ab_ref[...]
    o_ref[...] = out.astype(o_ref.dtype)


def head_block(cls, pool_w, pool_b, add_w, add_b):
    B, H = cls.shape
    O = add_w.shape[1]
    return pl.pallas_call(
        _head_kernel,
        out_shape=jax.ShapeDtypeStruct((B, O), jnp.float32),
        grid=(1,),
        in_specs=[pl.BlockSpec((B, H), lambda i: (0, 0)),
                  pl.BlockSpec((H, H), lambda i: (0, 0)),
                  pl.BlockSpec((1, H), lambda i: (0, 0)),
                  pl.BlockSpec((H, O), lambda i: (0, 0)),
                  pl.BlockSpec((1, O), lambda i: (0, 0))],
        out_specs=pl.BlockSpec((B, O), lambda i: (0, 0)),
        compiler_params=pltpu.CompilerParams(vmem_limit_bytes=VMEM_LIMIT),
    )(cls, pool_w, pool_b.reshape(1, H), add_w, add_b.reshape(1, O))


# ---------------------- BERT encoder (glue in JAX) ----------------------

CFG = dict(vocab=50, hidden=32, heads=4, layers=2, intermediate=64,
           max_pos=32, type_vocab=2)


def init_bert_encoder_params(key, cfg, out_dim, add_linear):
    H, I = cfg["hidden"], cfg["intermediate"]
    keys = iter(jax.random.split(key, 8 + 16 * cfg["layers"]))

    def nrm(shape):
        return jax.random.normal(next(keys), shape, dtype=jnp.float32) * 0.02

    p = {
        "word_emb": nrm((cfg["vocab"], H)),
        "pos_emb": nrm((cfg["max_pos"], H)),
        "type_emb": nrm((cfg["type_vocab"], H)),
        "emb_ln_g": jnp.ones((H,), jnp.float32),
        "emb_ln_b": jnp.zeros((H,), jnp.float32),
        "layers": [],
        "pool_w": nrm((H, H)).astype(jnp.bfloat16),
        "pool_b": jnp.zeros((H,), jnp.float32),
    }
    for _ in range(cfg["layers"]):
        wq, wk, wv = nrm((H, H)), nrm((H, H)), nrm((H, H))
        p["layers"].append({
            "wqkv": jnp.concatenate([wq, wk, wv], axis=1).astype(jnp.bfloat16),
            "bqkv": jnp.zeros((3 * H,), jnp.float32),
            "wo": nrm((H, H)).astype(jnp.bfloat16),
            "bo": jnp.zeros((H,), jnp.float32),
            "ln1_g": jnp.ones((H,), jnp.float32),
            "ln1_b": jnp.zeros((H,), jnp.float32),
            "wi": nrm((H, I)).astype(jnp.bfloat16),
            "bi": jnp.zeros((I,), jnp.float32),
            "wo2": nrm((I, H)).astype(jnp.bfloat16),
            "bo2": jnp.zeros((H,), jnp.float32),
            "ln2_g": jnp.ones((H,), jnp.float32),
            "ln2_b": jnp.zeros((H,), jnp.float32),
        })
    if add_linear:
        p["add_w"] = nrm((H, out_dim)).astype(jnp.bfloat16)
        p["add_b"] = jnp.zeros((out_dim,), jnp.float32)
    return p


def bert_encoder_forward(params, cfg, token_ids, segment_ids, attention_mask,
                         add_linear):
    B, S = token_ids.shape
    H, nH = cfg["hidden"], cfg["heads"]

    # TODO(synk): embedding-table gathers have no clean Pallas equivalent; they
    # stay in JAX glue. LayerNorm of the embedding sum runs in Pallas.
    x = (params["word_emb"][token_ids]
         + params["pos_emb"][jnp.arange(S)][None, :, :]
         + params["type_emb"][segment_ids])                      # (B, S, H) f32
    x = layernorm(x.reshape(B * S, H), params["emb_ln_g"], params["emb_ln_b"])
    x = x.reshape(B, S, H)                                       # bf16

    # Additive attention bias computed once (0 = attend, -10000 = masked).
    mask_bias = ((attention_mask.astype(jnp.float32) - 1.0) * 10000.0
                 ).reshape(B, 1, S)

    for layer in params["layers"]:
        x = encoder_layer(x, mask_bias, layer, nH)               # (B, S, H) bf16

    cls = x[:, 0, :]                                             # (B, H) bf16
    if add_linear:
        # nn.Dropout(0.1) is the identity at inference time.
        return head_block(cls, params["pool_w"], params["pool_b"],
                          params["add_w"], params["add_b"])
    return cls.astype(jnp.float32)


# ------------------------- BiEncoderModule.forward -------------------------

def bi_encoder_forward(ctxt_params, cand_params, cfg, add_linear,
                       token_idx_ctxt, segment_idx_ctxt, mask_ctxt,
                       token_idx_cands, segment_idx_cands, mask_cands):
    embedding_ctxt = None
    if token_idx_ctxt is not None:
        embedding_ctxt = bert_encoder_forward(
            ctxt_params, cfg, token_idx_ctxt, segment_idx_ctxt, mask_ctxt,
            add_linear)
    embedding_cands = None
    if token_idx_cands is not None:
        embedding_cands = bert_encoder_forward(
            cand_params, cfg, token_idx_cands, segment_idx_cands, mask_cands,
            add_linear)
    return embedding_ctxt, embedding_cands


if __name__ == "__main__":
    key = jax.random.PRNGKey(0)
    k_ctxt, k_cand, k_tok_c, k_tok_d = jax.random.split(key, 4)

    B, S = 2, 8
    out_dim = 16
    add_linear = True

    ctxt_params = init_bert_encoder_params(k_ctxt, CFG, out_dim, add_linear)
    cand_params = init_bert_encoder_params(k_cand, CFG, out_dim, add_linear)

    token_idx_ctxt = jax.random.randint(k_tok_c, (B, S), 0, CFG["vocab"],
                                        dtype=jnp.int32)
    token_idx_cands = jax.random.randint(k_tok_d, (B, S), 0, CFG["vocab"],
                                         dtype=jnp.int32)
    segment_idx_ctxt = jnp.zeros((B, S), jnp.int32)
    segment_idx_cands = jnp.concatenate(
        [jnp.zeros((B, S // 2), jnp.int32), jnp.ones((B, S // 2), jnp.int32)],
        axis=1)
    mask_ctxt = jnp.array([[1] * S, [1] * (S - 2) + [0, 0]], dtype=jnp.int32)
    mask_cands = jnp.ones((B, S), jnp.int32)

    emb_ctxt, emb_cands = bi_encoder_forward(
        ctxt_params, cand_params, CFG, add_linear,
        token_idx_ctxt, segment_idx_ctxt, mask_ctxt,
        token_idx_cands, segment_idx_cands, mask_cands)
    jax.block_until_ready((emb_ctxt, emb_cands))

    assert emb_ctxt.shape == (B, out_dim), emb_ctxt.shape
    assert emb_cands.shape == (B, out_dim), emb_cands.shape
    assert bool(jnp.all(jnp.isfinite(emb_ctxt))) and bool(
        jnp.all(jnp.isfinite(emb_cands)))
    print("KERNEL_OK")
</pallas_src>

<mosaic_0001>
module attributes {stable_mosaic.version = 11 : i64} {
  func.func @_layernorm_kernel(%arg0: i32, %arg1: memref<16x32xf32, #tpu.memory_space<vmem>>, %arg2: memref<1x32xf32, #tpu.memory_space<vmem>>, %arg3: memref<1x32xf32, #tpu.memory_space<vmem>>, %arg4: memref<16x32xbf16, #tpu.memory_space<vmem>>) attributes {dimension_semantics = [#tpu.dimension_semantics<parallel>], iteration_bounds = array<i64: 1>, scalar_prefetch = 0 : i64, scratch_operands = 0 : i64, tpu.core_type = #tpu.core_type<tc>, window_params = [{transform_indices = @transform_0, window_bounds = array<i64: 16, 32>}, {pipeline_mode = #tpu.pipeline_mode<synchronous>, transform_indices = @transform_1, window_bounds = array<i64: 1, 32>}, {pipeline_mode = #tpu.pipeline_mode<synchronous>, transform_indices = @transform_2, window_bounds = array<i64: 1, 32>}, {transform_indices = @transform_3, window_bounds = array<i64: 16, 32>}]} {
    %c0 = arith.constant 0 : index
    %c0_0 = arith.constant 0 : index
    %0 = vector.load %arg1[%c0, %c0_0] : memref<16x32xf32, #tpu.memory_space<vmem>>, vector<16x32xf32>
    %cst = arith.constant dense<0.000000e+00> : vector<16xf32>
    %1 = vector.multi_reduction <add>, %0, %cst [1] : vector<16x32xf32> to vector<16xf32>
    %2 = vector.shape_cast %1 : vector<16xf32> to vector<16x1xf32>
    %cst_1 = arith.constant 3.200000e+01 : f32
    %3 = vector.broadcast %cst_1 : f32 to vector<16x1xf32>
    %4 = arith.divf %2, %3 : vector<16x1xf32>
    %5 = vector.broadcast %4 : vector<16x1xf32> to vector<16x32xf32>
    %6 = arith.subf %0, %5 : vector<16x32xf32>
    %7 = arith.mulf %6, %6 : vector<16x32xf32>
    %cst_2 = arith.constant dense<0.000000e+00> : vector<16xf32>
    %8 = vector.multi_reduction <add>, %7, %cst_2 [1] : vector<16x32xf32> to vector<16xf32>
    %9 = vector.shape_cast %8 : vector<16xf32> to vector<16x1xf32>
    %cst_3 = arith.constant 3.200000e+01 : f32
    %10 = vector.broadcast %cst_3 : f32 to vector<16x1xf32>
    %11 = arith.divf %9, %10 : vector<16x1xf32>
    %12 = vector.broadcast %4 : vector<16x1xf32> to vector<16x32xf32>
    %13 = arith.subf %0, %12 : vector<16x32xf32>
    %cst_4 = arith.constant 9.99999996E-13 : f32
    %14 = vector.broadcast %cst_4 : f32 to vector<16x1xf32>
    %15 = arith.addf %11, %14 : vector<16x1xf32>
    %16 = math.rsqrt %15 : vector<16x1xf32>
    %17 = vector.broadcast %16 : vector<16x1xf32> to vector<16x32xf32>
    %18 = arith.mulf %13, %17 : vector<16x32xf32>
    %c0_5 = arith.constant 0 : index
    %c0_6 = arith.constant 0 : index
    %19 = vector.load %arg2[%c0_5, %c0_6] : memref<1x32xf32, #tpu.memory_space<vmem>>, vector<1x32xf32>
    %20 = vector.broadcast %19 : vector<1x32xf32> to vector<16x32xf32>
    %21 = arith.mulf %18, %20 : vector<16x32xf32>
    %c0_7 = arith.constant 0 : index
    %c0_8 = arith.constant 0 : index
    %22 = vector.load %arg3[%c0_7, %c0_8] : memref<1x32xf32, #tpu.memory_space<vmem>>, vector<1x32xf32>
    %23 = vector.broadcast %22 : vector<1x32xf32> to vector<16x32xf32>
    %24 = arith.addf %21, %23 : vector<16x32xf32>
    %25 = arith.truncf %24 : vector<16x32xf32> to vector<16x32xbf16>
    %c0_9 = arith.constant 0 : index
    %c0_10 = arith.constant 0 : index
    %26 = vector.load %arg4[%c0_9, %c0_10] : memref<16x32xbf16, #tpu.memory_space<vmem>>, vector<16x32xbf16>
    tpu.vector_store %arg4[%c0_9, %c0_10], %25 {strides = array<i32>} : memref<16x32xbf16, #tpu.memory_space<vmem>>, vector<16x32xbf16>,
    return
  }
  func.func @transform_0(%arg0: i32) -> (i32, i32) {
    %c0_i32 = arith.constant 0 : i32
    %c0_i32_0 = arith.constant 0 : i32
    return %arg0, %c0_i32 : i32, i32
  }
  func.func @transform_1(%arg0: i32) -> (i32, i32) {
    %c0_i32 = arith.constant 0 : i32
    %c0_i32_0 = arith.constant 0 : i32
    %c0_i32_1 = arith.constant 0 : i32
    return %c0_i32, %c0_i32_0 : i32, i32
  }
  func.func @transform_2(%arg0: i32) -> (i32, i32) {
    %c0_i32 = arith.constant 0 : i32
    %c0_i32_0 = arith.constant 0 : i32
    %c0_i32_1 = arith.constant 0 : i32
    return %c0_i32, %c0_i32_0 : i32, i32
  }
  func.func @transform_3(%arg0: i32) -> (i32, i32) {
    %c0_i32 = arith.constant 0 : i32
    %c0_i32_0 = arith.constant 0 : i32
    return %arg0, %c0_i32 : i32, i32
  }
}

</mosaic_0001>

<bundles_post_ra>
// kernel: tpu_custom_call.1
= control target key start
LH: loop header
LB: loop body
LE: loop exit
PB: predicated region body
PF: predicated region fallthrough
CT: control target
= control target key end

     0   :  { %8 = vsyncpa [#allocation3], 0  ;;  %s207_s0 = inlined_call_operand.hbm [shape: f32[16,32], index: 0, kind: input, shape index: {}]   ;;  %s208_s1 = inlined_call_operand.vmem [shape: f32[1,32], index: 1, kind: input, shape index: {}]   ;;  %s209_s2 = inlined_call_operand.vmem [shape: f32[1,32], index: 2, kind: input, shape index: {}]   ;;  %s210_s3 = inlined_call_operand.hbm [shape: bf16[16,32], index: 3, kind: output, shape index: {}]  }
   0x1   :  { %9 = vsyncpa [#allocation4], 0  ;;  %s165_s12 = smov [#allocation2]  }
   0x2   :  { %s15_s13 = sshll.u32 %s165_s12, 4  ;;  %s16_s13 = int_to_ptr.vmem [resolvable:$true] %s15_s13 }
   0x3   :  { %s129_s14 = scalar_lea.vmem %s16_s13, 256  ;;  %p134_p1 = scmp.lt.s32.totalorder %s16_s13, %s16_s13 }
   0x4   :  { %p130_p0 = scmp.ne.s32.totalorder %s16_s13, %s129_s14  ;;  %p135_p2 = scmp.lt.s32.totalorder %s129_s14, %s129_s14 }
   0x6   :  { %p136_p3 = por %p135_p2, %p134_p1 }
   0x8   :  { %p137_p4 = pnand %p136_p3, %p130_p0 }
   0xa   :  { %140 = shalt.err (!%p137_p4)
}
   0xb   :  { %s166_s15 = smov 128   ;;  %s167_s16 = smov 8  }
   0xc   :  { %21 = dma.hbm_to_vmem [thread:$0]  %s207_s0, 256, %s16_s13, [#allocation3], %s166_s15, %s166_s15, %s167_s16  }
   0xd   :  { %161 = dma.done.wait [#allocation3], 256  }
   0xe   :  { %162 = vsyncadd [#allocation3], 4294967040  ;;  %vm31_vm0 = vcmask 261120   ;;  %v29_v0 = vld [vmem:[#allocation2] sm:$0xff]  ;;  %v30_v1 = vld [vmem:[#allocation2 + $0x8] sm:$0xff]  ;;  %vm85_vm1 = vcmask 257024  }
   0xf   :  { %v32_v2 = vsel %vm31_vm0, %v29_v0, 0.0  ;;  %v35_v3 = vsel %vm31_vm0, %v30_v1, 0.0  ;;  %v105_v21 = vld [vmem:[%s208_s1] ss:$0 sm:$0xff]  ;;  %s168_s22 = smov [#allocation5]  }
  0x10   :  { %33 = vadd.xlane.f32.xlu0 %v32_v2  ;;  %v106_v23 = vld [vmem:[%s209_s2] ss:$0 sm:$0xff]  ;;  %s93_s23 = sshll.u32 %s168_s22, 4  ;;  %s94_s23 = int_to_ptr.vmem [resolvable:$true] %s93_s23 }
  0x11   :  { %s141_s1 = scalar_lea.vmem %s94_s23, 128  ;;  %p146_p6 = scmp.lt.s32.totalorder %s94_s23, %s94_s23 }
  0x12   :  { %p142_p5 = scmp.ne.s32.totalorder %s94_s23, %s141_s1  ;;  %p147_p7 = scmp.lt.s32.totalorder %s141_s1, %s141_s1 }
  0x14   :  { %36 = vadd.xlane.f32.xlu0 %v35_v3  ;;  %p148_p8 = por %p147_p7, %p146_p6 }
  0x16   :  { %p149_p9 = pnand %p148_p8, %p142_p5 }
  0x99   :  { %v34_v4 = vpop.xlane.xlu0 %33 }
  0x9a   :  { %v39_v5 = vmul.f32 0.03125, %v34_v4 }
  0x9c   :  { %v41_v6 = vsub.f32 %v29_v0, %v39_v5 }
  0x9d   :  { %v37_v7 = vpop.xlane.xlu0 %36 }
  0x9e   :  { %v40_v8 = vmul.f32 0.03125, %v37_v7  ;;  %v43_v9 = vmul.f32 %v41_v6, %v41_v6 }
  0xa0   :  { %v42_v10 = vsub.f32 %v30_v1, %v40_v8  ;;  %v45_v11 = vsel %vm31_vm0, %v43_v9, 0.0 }
  0xa1   :  { %46 = vadd.xlane.f32.xlu1 %v45_v11 }
  0xa2   :  { %v44_v12 = vmul.f32 %v42_v10, %v42_v10 }
  0xa4   :  { %v48_v13 = vsel %vm31_vm0, %v44_v12, 0.0 }
  0xa5   :  { %49 = vadd.xlane.f32.xlu1 %v48_v13 }
 0x12a   :  { %v47_v14 = vpop.xlane.xlu1 %46 }
 0x12b   :  { %v51_v15 = vmul.f32 0.03125, %v47_v14 }
 0x12d   :  { %v53_v16 = vadd.f32 1e-12, %v51_v15 }
 0x12e   :  { %v50_v17 = vpop.xlane.xlu1 %49 }
 0x12f   :  { %117 = vrsqrt.f32 %v53_v16  ;;  %v52_v18 = vmul.f32 0.03125, %v50_v17 }
 0x131   :  { %v54_v19 = vadd.f32 1e-12, %v52_v18 }
 0x133   :  { %119 = vrsqrt.f32 %v54_v19 }
 0x13c   :  { %v118_v20 = vpop.eup %117 }
 0x13d   :  { %v57_v22 = vmul.f32 %v118_v20, %v41_v6 }
 0x13f   :  { %v66_v24 = vmul.f32 %v105_v21, %v57_v22 }
 0x140   :  { %v120_v25 = vpop.eup %119 }
 0x141   :  { %v58_v26 = vmul.f32 %v120_v25, %v42_v10  ;;  %v75_v27 = vadd.f32 %v106_v23, %v66_v24 }
 0x143   :  { %v67_v28 = vmul.f32 %v105_v21, %v58_v26  ;;  %v109_v29 = vpack.c.bf16 %v75_v27, %v75_v27 }
 0x145   :  { %v76_v30 = vadd.f32 %v106_v23, %v67_v28  ;;  %86 = vst.msk [vmem:[#allocation5] sm:$0xf] %vm85_vm1, %v109_v29 }
 0x147   :  { %v110_v31 = vpack.c.bf16 %v76_v30, %v76_v30 }
 0x149   :  { %87 = vst.msk [vmem:[#allocation5 + $0x4] sm:$0xf] %vm85_vm1, %v110_v31 }
 0x14a   :  { %152 = shalt.err (!%p149_p9)
}
 0x14b   :  { %s169_s2 = smov 64   ;;  %s170_s24 = smov 4  }
 0x14c   :  { %99 = dma.vmem_to_hbm [thread:$0]  %s94_s23, 128, %s210_s3, [#allocation4], %s169_s2, %s169_s2, %s170_s24  }
 0x14d   :  { %163 = dma.done.wait [#allocation4], 128  }
 0x14e   :  { %164 = vsyncadd [#allocation4], 4294967168 }
 0x14f   :  { %103 = vsyncpa [#allocation3], 1 }
 0x150   :  { %104 = vsyncpa [#allocation4], 1 }

</bundles_post_ra>
